<compile_context>
chip_gen: v7x
topology: tpu7x:2x2x1
jax: 0.10.0
libtpu: 0.0.40
codegen_flags: <defaults>
</compile_context>

<pallas_src>
import functools

import jax
import jax.numpy as jnp
from jax import lax
from jax.experimental import pallas as pl
from jax.experimental.pallas import tpu as pltpu

_LANES = 128
_SUBLANES = 8
# (1024, 128) f32 block = 512 KiB; x2 inputs x2 double-buffering + accumulators
# stays a few MiB, far under every generation's VMEM budget (incl. v7x 64 MiB).
_MAX_BLOCK_ROWS = 1024


def _sumsq_kernel(*refs, targets, block_rows, n_valid, needs_mask):
    """For each input i: accumulate sum((x_i - targets[i])^2) over the grid.

    refs layout: (in_0..in_{k-1}, out_0..out_{k-1}, acc_0..acc_{k-1})
      in_i  : (block_rows, 128) VMEM tile of the flattened scores
      out_i : (1, 1) SMEM scalar result
      acc_i : (block_rows, 128) f32 VMEM accumulator (persists across grid)
    """
    k = len(targets)
    in_refs = refs[:k]
    out_refs = refs[k:2 * k]
    acc_refs = refs[2 * k:]

    step = pl.program_id(0)

    @pl.when(step == 0)
    def _init():
        for acc in acc_refs:
            acc[...] = jnp.zeros_like(acc)

    if needs_mask:
        # Mask out pad elements / partial-last-block garbage using the true
        # (static) element count.  Pure VPU work, hidden under the HBM stream.
        row = lax.broadcasted_iota(jnp.int32, (block_rows, _LANES), 0)
        lane = lax.broadcasted_iota(jnp.int32, (block_rows, _LANES), 1)
        gidx = (step * block_rows + row) * _LANES + lane
        mask = gidx < n_valid

    for x_ref, acc, t in zip(in_refs, acc_refs, targets):
        d = x_ref[...].astype(jnp.float32) - jnp.float32(t)
        sq = d * d
        if needs_mask:
            sq = jnp.where(mask, sq, jnp.float32(0.0))
        acc[...] += sq  # element-wise VPU accumulate; no per-step reduce

    @pl.when(step == pl.num_programs(0) - 1)
    def _finalize():
        for acc, out in zip(acc_refs, out_refs):
            out[0, 0] = jnp.sum(acc[...])  # single cross-lane reduce


def _sum_sq_diffs(xs, targets):
    """[sum((x - t)^2) for x, t in zip(xs, targets)] in ONE pallas_call.

    All xs must have the same number of elements (same grid / BlockSpecs).
    """
    k = len(xs)
    n = xs[0].size
    assert all(x.size == n for x in xs)

    # Pad (only if needed) to a multiple of one (8, 128) tile so the 2D slab
    # reshape is legal and rows are a multiple of 8.  Pad is < 1024 elements;
    # the padded zeros are excluded by the in-kernel mask.
    tile_elems = _SUBLANES * _LANES
    padded = pl.cdiv(n, tile_elems) * tile_elems
    slabs = []
    for x in xs:
        flat = x.reshape(-1)              # keep original dtype in HBM
        if padded != n:
            flat = jnp.pad(flat, (0, padded - n))
        slabs.append(flat.reshape(padded // _LANES, _LANES))

    m = padded // _LANES                  # rows, multiple of 8
    block_rows = min(_MAX_BLOCK_ROWS, m)  # multiple of 8
    grid = (pl.cdiv(m, block_rows),)
    needs_mask = (padded != n) or (m % block_rows != 0)

    kernel = functools.partial(
        _sumsq_kernel,
        targets=tuple(float(t) for t in targets),
        block_rows=block_rows,
        n_valid=n,
        needs_mask=needs_mask,
    )

    outs = pl.pallas_call(
        kernel,
        out_shape=[jax.ShapeDtypeStruct((1, 1), jnp.float32)] * k,
        grid_spec=pltpu.PrefetchScalarGridSpec(
            num_scalar_prefetch=0,
            grid=grid,
            in_specs=[
                pl.BlockSpec((block_rows, _LANES), lambda i: (i, 0))
                for _ in range(k)
            ],
            out_specs=[
                pl.BlockSpec((1, 1), lambda i: (0, 0), memory_space=pltpu.SMEM)
                for _ in range(k)
            ],
            scratch_shapes=[pltpu.VMEM((block_rows, _LANES), jnp.float32)] * k,
        ),
        compiler_params=pltpu.CompilerParams(
            dimension_semantics=("arbitrary",)
        ),
    )(*slabs)
    return [o[0, 0] for o in outs]


def msed_loss(score_fake, score_real):
    """JAX/Pallas equivalent of MSEDLoss.forward -> (loss_d, loss_real, loss_fake)."""
    if score_real.size == score_fake.size:
        # Fused: one launch, one DMA pipeline for both reductions.
        ss_real, ss_fake = _sum_sq_diffs([score_real, score_fake], [1.0, 0.0])
    else:
        (ss_real,) = _sum_sq_diffs([score_real], [1.0])
        (ss_fake,) = _sum_sq_diffs([score_fake], [0.0])
    loss_real = ss_real / jnp.float32(score_real.size)
    loss_fake = ss_fake / jnp.float32(score_fake.size)
    loss_d = loss_real + loss_fake
    return loss_d, loss_real, loss_fake


if __name__ == "__main__":
    key = jax.random.PRNGKey(0)
    k_fake, k_real = jax.random.split(key)

    # Discriminator score maps, NCHW-like small shapes.
    score_fake = jax.random.normal(k_fake, (2, 4, 16, 16), dtype=jnp.float32)
    score_real = jax.random.normal(k_real, (2, 4, 16, 16), dtype=jnp.float32)

    loss_d, loss_real, loss_fake = msed_loss(score_fake, score_real)
    jax.block_until_ready((loss_d, loss_real, loss_fake))

    # Reference check in plain JAX (MSELoss semantics: mean over all elems).
    ref_real = jnp.mean((score_real - 1.0) ** 2)
    ref_fake = jnp.mean(score_fake ** 2)
    ref_d = ref_real + ref_fake
    assert jnp.allclose(loss_real, ref_real, rtol=1e-5, atol=1e-6)
    assert jnp.allclose(loss_fake, ref_fake, rtol=1e-5, atol=1e-6)
    assert jnp.allclose(loss_d, ref_d, rtol=1e-5, atol=1e-6)

    print("KERNEL_OK")
</pallas_src>

<mosaic_0001>
module attributes {stable_mosaic.version = 11 : i64} {
  func.func @_sumsq_kernel(%arg0: i32, %arg1: memref<16x128xf32, #tpu.memory_space<vmem>>, %arg2: memref<16x128xf32, #tpu.memory_space<vmem>>, %arg3: memref<1x1xf32, #tpu.memory_space<smem>>, %arg4: memref<1x1xf32, #tpu.memory_space<smem>>, %arg5: memref<16x128xf32, #tpu.memory_space<vmem>>, %arg6: memref<16x128xf32, #tpu.memory_space<vmem>>) attributes {dimension_semantics = [#tpu.dimension_semantics<arbitrary>], iteration_bounds = array<i64: 1>, scalar_prefetch = 0 : i64, scratch_operands = 2 : i64, tpu.core_type = #tpu.core_type<tc>, window_params = [{transform_indices = @transform_0, window_bounds = array<i64: 16, 128>}, {transform_indices = @transform_1, window_bounds = array<i64: 16, 128>}, {transform_indices = @transform_2, window_bounds = array<i64: 1, 1>}, {transform_indices = @transform_3, window_bounds = array<i64: 1, 1>}]} {
    %c0_i32 = arith.constant 0 : i32
    %0 = arith.cmpi eq, %arg0, %c0_i32 : i32
    %1 = arith.extui %0 : i1 to i32
    %c0_i32_0 = arith.constant 0 : i32
    %2 = arith.cmpi ne, %1, %c0_i32_0 : i32
    scf.if %2 {
      %cst_15 = arith.constant 0.000000e+00 : f32
      %20 = vector.broadcast %cst_15 : f32 to vector<16x128xf32>
      %c0_16 = arith.constant 0 : index
      %c0_17 = arith.constant 0 : index
      %21 = vector.load %arg5[%c0_16, %c0_17] : memref<16x128xf32, #tpu.memory_space<vmem>>, vector<16x128xf32>
      tpu.vector_store %arg5[%c0_16, %c0_17], %20 {strides = array<i32>} : memref<16x128xf32, #tpu.memory_space<vmem>>, vector<16x128xf32>,
      %cst_18 = arith.constant 0.000000e+00 : f32
      %22 = vector.broadcast %cst_18 : f32 to vector<16x128xf32>
      %c0_19 = arith.constant 0 : index
      %c0_20 = arith.constant 0 : index
      %23 = vector.load %arg6[%c0_19, %c0_20] : memref<16x128xf32, #tpu.memory_space<vmem>>, vector<16x128xf32>
      tpu.vector_store %arg6[%c0_19, %c0_20], %22 {strides = array<i32>} : memref<16x128xf32, #tpu.memory_space<vmem>>, vector<16x128xf32>,
    } else {
    }
    %c0 = arith.constant 0 : index
    %c0_1 = arith.constant 0 : index
    %3 = vector.load %arg1[%c0, %c0_1] : memref<16x128xf32, #tpu.memory_space<vmem>>, vector<16x128xf32>
    %cst = arith.constant 1.000000e+00 : f32
    %4 = vector.broadcast %cst : f32 to vector<16x128xf32>
    %5 = arith.subf %3, %4 : vector<16x128xf32>
    %6 = arith.mulf %5, %5 : vector<16x128xf32>
    %c0_2 = arith.constant 0 : index
    %c0_3 = arith.constant 0 : index
    %7 = vector.load %arg5[%c0_2, %c0_3] : memref<16x128xf32, #tpu.memory_space<vmem>>, vector<16x128xf32>
    %8 = arith.addf %7, %6 : vector<16x128xf32>
    %c0_4 = arith.constant 0 : index
    %c0_5 = arith.constant 0 : index
    %9 = vector.load %arg5[%c0_4, %c0_5] : memref<16x128xf32, #tpu.memory_space<vmem>>, vector<16x128xf32>
    tpu.vector_store %arg5[%c0_4, %c0_5], %8 {strides = array<i32>} : memref<16x128xf32, #tpu.memory_space<vmem>>, vector<16x128xf32>,
    %c0_6 = arith.constant 0 : index
    %c0_7 = arith.constant 0 : index
    %10 = vector.load %arg2[%c0_6, %c0_7] : memref<16x128xf32, #tpu.memory_space<vmem>>, vector<16x128xf32>
    %cst_8 = arith.constant 0.000000e+00 : f32
    %11 = vector.broadcast %cst_8 : f32 to vector<16x128xf32>
    %12 = arith.subf %10, %11 : vector<16x128xf32>
    %13 = arith.mulf %12, %12 : vector<16x128xf32>
    %c0_9 = arith.constant 0 : index
    %c0_10 = arith.constant 0 : index
    %14 = vector.load %arg6[%c0_9, %c0_10] : memref<16x128xf32, #tpu.memory_space<vmem>>, vector<16x128xf32>
    %15 = arith.addf %14, %13 : vector<16x128xf32>
    %c0_11 = arith.constant 0 : index
    %c0_12 = arith.constant 0 : index
    %16 = vector.load %arg6[%c0_11, %c0_12] : memref<16x128xf32, #tpu.memory_space<vmem>>, vector<16x128xf32>
    tpu.vector_store %arg6[%c0_11, %c0_12], %15 {strides = array<i32>} : memref<16x128xf32, #tpu.memory_space<vmem>>, vector<16x128xf32>,
    %c0_i32_13 = arith.constant 0 : i32
    %17 = arith.cmpi eq, %arg0, %c0_i32_13 : i32
    %18 = arith.extui %17 : i1 to i32
    %c0_i32_14 = arith.constant 0 : i32
    %19 = arith.cmpi ne, %18, %c0_i32_14 : i32
    scf.if %19 {
      %c0_15 = arith.constant 0 : index
      %c0_16 = arith.constant 0 : index
      %20 = vector.load %arg5[%c0_15, %c0_16] : memref<16x128xf32, #tpu.memory_space<vmem>>, vector<16x128xf32>
      %21 = vector.shape_cast %20 : vector<16x128xf32> to vector<1x16x128xf32>
      %cst_17 = arith.constant dense<0.000000e+00> : vector<1xf32>
      %22 = vector.multi_reduction <add>, %21, %cst_17 [1, 2] : vector<1x16x128xf32> to vector<1xf32>
      %23 = vector.shape_cast %22 : vector<1xf32> to vector<1x1x1xf32>
      %24 = vector.extract %23[0, 0, 0] : f32 from vector<1x1x1xf32>
      %c0_18 = arith.constant 0 : index
      %c0_19 = arith.constant 0 : index
      %25 = memref.load %arg3[%c0_18, %c0_19] : memref<1x1xf32, #tpu.memory_space<smem>>
      memref.store %24, %arg3[%c0_18, %c0_19] : memref<1x1xf32, #tpu.memory_space<smem>>
      %c0_20 = arith.constant 0 : index
      %c0_21 = arith.constant 0 : index
      %26 = vector.load %arg6[%c0_20, %c0_21] : memref<16x128xf32, #tpu.memory_space<vmem>>, vector<16x128xf32>
      %27 = vector.shape_cast %26 : vector<16x128xf32> to vector<1x16x128xf32>
      %cst_22 = arith.constant dense<0.000000e+00> : vector<1xf32>
      %28 = vector.multi_reduction <add>, %27, %cst_22 [1, 2] : vector<1x16x128xf32> to vector<1xf32>
      %29 = vector.shape_cast %28 : vector<1xf32> to vector<1x1x1xf32>
      %30 = vector.extract %29[0, 0, 0] : f32 from vector<1x1x1xf32>
      %c0_23 = arith.constant 0 : index
      %c0_24 = arith.constant 0 : index
      %31 = memref.load %arg4[%c0_23, %c0_24] : memref<1x1xf32, #tpu.memory_space<smem>>
      memref.store %30, %arg4[%c0_23, %c0_24] : memref<1x1xf32, #tpu.memory_space<smem>>
    } else {
    }
    return
  }
  func.func @transform_0(%arg0: i32) -> (i32, i32) {
    %c0_i32 = arith.constant 0 : i32
    %c0_i32_0 = arith.constant 0 : i32
    return %arg0, %c0_i32 : i32, i32
  }
  func.func @transform_1(%arg0: i32) -> (i32, i32) {
    %c0_i32 = arith.constant 0 : i32
    %c0_i32_0 = arith.constant 0 : i32
    return %arg0, %c0_i32 : i32, i32
  }
  func.func @transform_2(%arg0: i32) -> (i32, i32) {
    %c0_i32 = arith.constant 0 : i32
    %c0_i32_0 = arith.constant 0 : i32
    %c0_i32_1 = arith.constant 0 : i32
    return %c0_i32, %c0_i32_0 : i32, i32
  }
  func.func @transform_3(%arg0: i32) -> (i32, i32) {
    %c0_i32 = arith.constant 0 : i32
    %c0_i32_0 = arith.constant 0 : i32
    %c0_i32_1 = arith.constant 0 : i32
    return %c0_i32, %c0_i32_0 : i32, i32
  }
}

</mosaic_0001>

<bundles_post_ra>
// kernel: tpu_custom_call.1
= control target key start
LH: loop header
LB: loop body
LE: loop exit
PB: predicated region body
PF: predicated region fallthrough
CT: control target
= control target key end

     0   :  { %9 = vsyncpa [#allocation5], 0  ;;  %s289_s0 = inlined_call_operand.hbm [shape: f32[16,128], index: 0, kind: input, shape index: {}]   ;;  %s290_s1 = inlined_call_operand.hbm [shape: f32[16,128], index: 1, kind: input, shape index: {}]   ;;  %s291_s2 = inlined_call_operand.hbm [shape: f32[1,1], index: 2, kind: output, shape index: {0}]   ;;  %s292_s3 = inlined_call_operand.hbm [shape: f32[1,1], index: 3, kind: output, shape index: {1}]  }
   0x1   :  { %10 = vsyncpa [#allocation8], 0 }
   0x2   :  { %11 = vsyncpa [#allocation6], 0 }
   0x3   :  { %12 = vsyncpa [#allocation11], 0  ;;  %s215_s12 = smov [#allocation4]   ;;  %s143_s16 = scalar_lea.hbm %s289_s0, 256 }
   0x4   :  { %s18_s13 = sshll.u32 %s215_s12, 4  ;;  %p144_p0 = scmp.ne.s32.totalorder %s289_s0, %s143_s16  ;;  %s19_s13 = int_to_ptr.vmem [resolvable:$true] %s18_s13 }
   0x5   :  { %p147_p1 = scmp.lt.u32.totalorder %s143_s16, %s289_s0 }
   0x7   :  { %p149_p2 = pnand %p147_p1, %p144_p0 }
   0x9   :  { %152 = shalt.err (!%p149_p2)
}
   0xa   :  { %s153_s21 = scalar_lea.vmem %s19_s13, 256  ;;  %p158_p4 = scmp.lt.s32.totalorder %s19_s13, %s19_s13 }
   0xb   :  { %p154_p3 = scmp.ne.s32.totalorder %s19_s13, %s153_s21  ;;  %p159_p5 = scmp.lt.s32.totalorder %s153_s21, %s153_s21 }
   0xd   :  { %p160_p6 = por %p159_p5, %p158_p4 }
   0xf   :  { %p161_p7 = pnand %p160_p6, %p154_p3 }
  0x11   :  { %164 = shalt.err (!%p161_p7)
}
  0x12   :  { %s216_s22 = smov 128   ;;  %s217_s23 = smov 8  }
  0x13   :  { %24 = dma.hbm_to_vmem [thread:$0]  %s289_s0, 256, %s19_s13, [#allocation5], %s216_s22, %s216_s22, %s217_s23  }
  0x14   :  { %s218_s26 = smov [#allocation7]   ;;  %s165_s30 = scalar_lea.hbm %s290_s1, 256 }
  0x15   :  { %s30_s27 = sshll.u32 %s218_s26, 4  ;;  %p166_p8 = scmp.ne.s32.totalorder %s290_s1, %s165_s30  ;;  %s31_s27 = int_to_ptr.vmem [resolvable:$true] %s30_s27 }
  0x16   :  { %p169_p9 = scmp.lt.u32.totalorder %s165_s30, %s290_s1 }
  0x18   :  { %p171_p10 = pnand %p169_p9, %p166_p8 }
  0x1a   :  { %174 = shalt.err (!%p171_p10)
}
  0x1b   :  { %s175_s8 = scalar_lea.vmem %s31_s27, 256  ;;  %p180_p12 = scmp.lt.s32.totalorder %s31_s27, %s31_s27 }
  0x1c   :  { %p176_p11 = scmp.ne.s32.totalorder %s31_s27, %s175_s8  ;;  %p181_p13 = scmp.lt.s32.totalorder %s175_s8, %s175_s8 }
  0x1e   :  { %p182_p0 = por %p181_p13, %p180_p12 }
  0x20   :  { %p183_p1 = pnand %p182_p0, %p176_p11 }
  0x22   :  { %186 = shalt.err (!%p183_p1)
}
  0x23   :  { %36 = dma.hbm_to_vmem [thread:$0]  %s290_s1, 256, %s31_s27, [#allocation8], %s216_s22, %s216_s22, %s217_s23  }
  0x24   :  { %207 = dma.done.wait [#allocation5], 256  }
  0x25   :  { %208 = vsyncadd [#allocation5], 4294967040 }
  0x26   :  { %209 = dma.done.wait [#allocation8], 256  }
  0x27   :  { %210 = vsyncadd [#allocation8], 4294967040  ;;  %v51_v0 = vld [vmem:[#allocation4] sm:$0xff]  ;;  %v52_v1 = vld [vmem:[#allocation4 + $0x8] sm:$0xff]  ;;  %s187_s12 = scalar_lea.hbm %s291_s2, 16 }
  0x28   :  { %v63_v2 = vld [vmem:[#allocation7] sm:$0xff]  ;;  %v131_v3 = vadd.f32 -1.0, %v51_v0  ;;  %v132_v4 = vadd.f32 -1.0, %v52_v1  ;;  %v64_v5 = vld [vmem:[#allocation7 + $0x8] sm:$0xff]  ;;  %p188_p2 = scmp.ne.s32.totalorder %s291_s2, %s187_s12  ;;  %p191_p3 = scmp.lt.u32.totalorder %s187_s12, %s291_s2 }
  0x29   :  { %v65_v8 = vmul.f32 %v63_v2, %v63_v2  ;;  %v66_v9 = vmul.f32 %v64_v5, %v64_v5 }
  0x2a   :  { %v55_v6 = vmul.f32 %v131_v3, %v131_v3  ;;  %v56_v7 = vmul.f32 %v132_v4, %v132_v4  ;;  %p193_p4 = pnand %p191_p3, %p188_p2 }
  0x2b   :  { %v92_v11 = vadd.f32 %v66_v9, %v65_v8 }
  0x2c   :  { %v78_v10 = vadd.f32 %v56_v7, %v55_v6 }
  0x2e   :  { %79 = vadd.xlane.f32.xlu0 %v78_v10 }
  0x32   :  { %93 = vadd.xlane.f32.xlu0 %v92_v11 }
  0xbb   :  { %v80_v12 = vpop.xlane.xlu0 %79 }
  0xbc   :  { %v81_v13 = vrot.slane %v80_v12, 4 }
  0xbe   :  { %v82_v14 = vadd.f32 %v81_v13, %v80_v12 }
  0xbf   :  { %v94_v15 = vpop.xlane.xlu0 %93 }
  0xc0   :  { %v83_v16 = vrot.slane %v82_v14, 2  ;;  %v95_v17 = vrot.slane %v94_v15, 4 }
  0xc2   :  { %v96_v18 = vadd.f32 %v95_v17, %v94_v15  ;;  %v84_v19 = vadd.f32 %v83_v16, %v82_v14 }
  0xc4   :  { %v97_v20 = vrot.slane %v96_v18, 2  ;;  %v85_v21 = vrot.slane %v84_v19, 1 }
  0xc6   :  { %v98_v22 = vadd.f32 %v97_v20, %v96_v18  ;;  %v86_v23 = vadd.f32 %v85_v21, %v84_v19 }
  0xc8   :  { %133 = vpush %v86_v23  ;;  %v99_v24 = vrot.slane %v98_v22, 1 }
  0xca   :  { %v100_v25 = vadd.f32 %v99_v24, %v98_v22 }
  0xcc   :  { %135 = vpush %v100_v25 }
  0xf9   :  { %s134_s1 = spop %133 }
  0xfa   :  { %89 = sst [smem:[#allocation9]] %s134_s1 }
  0xfb   :  { %196 = shalt.err (!%p193_p4)
}
  0xfc   :  { %s219_s17 = smov [#allocation9]   ;;  %s197_s23 = scalar_lea.hbm %s292_s3, 16 }
  0xfd   :  { %111 = dma.smem_to_hbm %s219_s17, 16, %s291_s2, [#allocation6]  }
  0xfe   :  { %s136_s20 = spop %135  ;;  %p198_p5 = scmp.ne.s32.totalorder %s292_s3, %s197_s23 }
  0xff   :  { %103 = sst [smem:[#allocation10]] %s136_s20  ;;  %p201_p6 = scmp.lt.u32.totalorder %s197_s23, %s292_s3 }
 0x101   :  { %p203_p7 = pnand %p201_p6, %p198_p5 }
 0x103   :  { %206 = shalt.err (!%p203_p7)
}
 0x104   :  { %s220_s28 = smov [#allocation10]  }
 0x105   :  { %119 = dma.smem_to_hbm %s220_s28, 16, %s292_s3, [#allocation11]  }
 0x106   :  { %211 = dma.done.wait [#allocation6], 16  }
 0x107   :  { %212 = vsyncadd [#allocation6], 4294967280 }
 0x108   :  { %213 = dma.done.wait [#allocation11], 16  }
 0x109   :  { %214 = vsyncadd [#allocation11], 4294967280 }
 0x10a   :  { %126 = sfence }
 0x10b   :  { %127 = vsyncpa [#allocation5], 1 }
 0x10c   :  { %128 = vsyncpa [#allocation8], 1 }
 0x10d   :  { %129 = vsyncpa [#allocation6], 1 }
 0x10e   :  { %130 = vsyncpa [#allocation11], 1 }

</bundles_post_ra>
